<compile_context>
chip_gen: v5e
topology: v5e:2x2
jax: 0.10.0
libtpu: 0.0.40
codegen_flags: <defaults>
</compile_context>

<pallas_src>
import jax
import jax.numpy as jnp
from jax.experimental import pallas as pl
from jax.experimental.pallas import tpu as pltpu

NUM_LABELS = 3
LANES = 128          # classifier output padded to a full lane group


def _round_up(x, m):
    return (x + m - 1) // m * m


def _nli_head_kernel(x_ref, mask_ref, w_ref, b_ref, labels_ref,
                     logits_ref, nll_ref):
    """One batch tile: masked mean pool -> padded linear head -> per-row CE."""
    # bf16 activations are upcast to f32 in-register for the pooling math.
    x = x_ref[...].astype(jnp.float32)                            # [TB, L, H]
    m = mask_ref[...]                                             # [TB, L] f32

    # masked mean pooling over the sequence axis
    masked = x * m[:, :, None]                                    # [TB, L, H]
    denom = jnp.maximum(jnp.sum(m, axis=1, keepdims=True), 1.0)   # [TB, 1]
    pooled = jnp.sum(masked, axis=1) / denom                      # [TB, H]

    # Lane-dense classifier head: w/b are zero-padded to 128 output columns,
    # so the logits store is an unmasked full-lane vst and the MXU gets a
    # full-width column tile.
    logits = jnp.dot(pooled, w_ref[...],
                     preferred_element_type=jnp.float32) + b_ref[...]   # [TB, 128]
    logits_ref[...] = logits

    # Cross-entropy restricted to the first NUM_LABELS columns (pad -> -inf).
    col = jax.lax.broadcasted_iota(jnp.int32, logits.shape, 1)           # [TB, 128]
    z = jnp.where(col < NUM_LABELS, logits, -jnp.inf)
    mx = jnp.max(z, axis=-1, keepdims=True)
    lse = mx + jnp.log(jnp.sum(jnp.exp(z - mx), axis=-1, keepdims=True))
    logp = z - lse                                                        # [TB, 128]

    # Integer labels; padded batch rows carry -1 -> contribute exactly 0 loss.
    onehot = col == labels_ref[...]                                       # [TB, 128]
    nll = -jnp.sum(jnp.where(onehot, logp, 0.0), axis=-1, keepdims=True)  # [TB, 1]
    # Lane-dense per-row NLL; summed and divided by the *true* B in the wrapper
    # so the loss is correct no matter how the batch is tiled across the grid.
    nll_ref[...] = jnp.broadcast_to(nll, nll_ref.shape)


def nli_forward(input_ids, attention_mask, labels, embed_table, w_cls, b_cls,
                *, block_b=128):
    """Embedding gather (bf16) as glue, pooled classifier + CE in Pallas."""
    B, L = input_ids.shape
    H = embed_table.shape[1]
    num_labels = w_cls.shape[1]

    # Batch tile: multiple of 8 sublanes, capped by the (padded) batch size.
    tb = min(block_b, _round_up(B, 8))
    B_pad = _round_up(B, tb)
    pad = B_pad - B

    # Keep gathered activations in bf16 in HBM: halves DMA bytes of the dominant
    # input.  TODO(synk): fuse the embedding gather into the kernel (scalar-
    # prefetched input_ids + per-row DMA) to remove this HBM round trip entirely.
    x = jnp.take(embed_table.astype(jnp.bfloat16), input_ids, axis=0)     # [B, L, H]
    mask_f = attention_mask.astype(jnp.float32)                           # [B, L]
    labels_i = labels.astype(jnp.int32)                                   # [B]

    if pad:
        x = jnp.pad(x, ((0, pad), (0, 0), (0, 0)))
        mask_f = jnp.pad(mask_f, ((0, pad), (0, 0)))
        labels_i = jnp.pad(labels_i, ((0, pad),), constant_values=-1)
    labels_2d = labels_i.reshape(B_pad, 1)

    # Zero-pad the classifier to 128 output lanes (sliced back below).
    w_pad = jnp.zeros((H, LANES), jnp.float32).at[:, :num_labels].set(
        w_cls.astype(jnp.float32))
    b_pad = jnp.zeros((1, LANES), jnp.float32).at[:, :num_labels].set(
        b_cls.reshape(1, num_labels).astype(jnp.float32))

    num_tiles = B_pad // tb

    # VMEM budget: double-buffered per-tile inputs/outputs + resident weights.
    x_blk = tb * L * H * 2
    mask_blk = tb * L * 4
    lab_blk = tb * 128 * 4
    out_blk = tb * LANES * 4
    fixed = (H * LANES + LANES) * 4
    needed = 2 * (x_blk + mask_blk + lab_blk + 2 * out_blk) + 2 * fixed + (8 << 20)
    vmem_limit = int(min(64 << 20, max(32 << 20, needed)))

    flops = 2 * B_pad * L * H + 2 * B_pad * H * LANES + 8 * B_pad * LANES
    transcendentals = B_pad * (LANES + 1)
    bytes_accessed = (B_pad * L * H * 2 + B_pad * L * 4 + B_pad * 4
                      + (H + 1) * LANES * 4 + 2 * B_pad * LANES * 4)

    # TODO(synk): for very long sequences (L >= 512) add an inner "arbitrary"
    # reduction grid axis over L with pooled/denom accumulators.
    logits_pad, nll_rows = pl.pallas_call(
        _nli_head_kernel,
        out_shape=(
            jax.ShapeDtypeStruct((B_pad, LANES), jnp.float32),   # padded logits
            jax.ShapeDtypeStruct((B_pad, LANES), jnp.float32),   # per-row NLL
        ),
        grid_spec=pltpu.PrefetchScalarGridSpec(
            num_scalar_prefetch=0,
            grid=(num_tiles,),
            in_specs=[
                pl.BlockSpec((tb, L, H), lambda i: (i, 0, 0)),   # x (bf16)
                pl.BlockSpec((tb, L), lambda i: (i, 0)),         # attention mask
                pl.BlockSpec((H, LANES), lambda i: (0, 0)),      # padded W (resident)
                pl.BlockSpec((1, LANES), lambda i: (0, 0)),      # padded b (resident)
                pl.BlockSpec((tb, 1), lambda i: (i, 0)),         # int labels
            ],
            out_specs=(
                pl.BlockSpec((tb, LANES), lambda i: (i, 0)),
                pl.BlockSpec((tb, LANES), lambda i: (i, 0)),
            ),
        ),
        compiler_params=pltpu.CompilerParams(
            dimension_semantics=("parallel",),   # batch tiles shard across TCs on v7x
            vmem_limit_bytes=vmem_limit,
        ),
        cost_estimate=pl.CostEstimate(
            flops=flops,
            transcendentals=transcendentals,
            bytes_accessed=bytes_accessed,
        ),
    )(x, mask_f, w_pad, b_pad, labels_2d)

    logits = logits_pad[:B, :num_labels]            # [B, 3]
    loss = jnp.sum(nll_rows[:B, 0]) / B             # global batch mean
    return loss, logits


if __name__ == "__main__":
    # small shapes consistent with the NLI interface
    B, L, H, V = 2, 8, 32, 128

    key = jax.random.PRNGKey(0)
    k_ids, k_emb, k_w, k_b, k_lab = jax.random.split(key, 5)

    input_ids = jax.random.randint(k_ids, (B, L), 0, V, dtype=jnp.int32)
    attention_mask = jnp.ones((B, L), dtype=jnp.int32).at[:, L - 2:].set(0)
    labels = jax.random.randint(k_lab, (B,), 0, NUM_LABELS, dtype=jnp.int32)

    # deterministic synthetic parameters (no checkpoint load)
    embed_table = jax.random.normal(k_emb, (V, H), dtype=jnp.float32) * 0.02
    w_cls = jax.random.normal(k_w, (H, NUM_LABELS), dtype=jnp.float32) * 0.02
    b_cls = jnp.zeros((NUM_LABELS,), dtype=jnp.float32)

    loss, logits = nli_forward(input_ids, attention_mask, labels,
                               embed_table, w_cls, b_cls)
    jax.block_until_ready((loss, logits))

    assert logits.shape == (B, NUM_LABELS)
    assert loss.shape == ()
    assert bool(jnp.isfinite(loss))
    print("KERNEL_OK")
</pallas_src>

<mosaic_0001>
module attributes {stable_mosaic.version = 11 : i64} {
  func.func @_nli_head_kernel(%arg0: i32, %arg1: memref<8x8x32xbf16, #tpu.memory_space<vmem>>, %arg2: memref<8x8xf32, #tpu.memory_space<vmem>>, %arg3: memref<32x128xf32, #tpu.memory_space<vmem>>, %arg4: memref<1x128xf32, #tpu.memory_space<vmem>>, %arg5: memref<8x1xi32, #tpu.memory_space<vmem>>, %arg6: memref<8x128xf32, #tpu.memory_space<vmem>>, %arg7: memref<8x128xf32, #tpu.memory_space<vmem>>) attributes {dimension_semantics = [#tpu.dimension_semantics<parallel>], iteration_bounds = array<i64: 1>, scalar_prefetch = 0 : i64, scratch_operands = 0 : i64, tpu.core_type = #tpu.core_type<tc>, window_params = [{transform_indices = @transform_0, window_bounds = array<i64: 8, 8, 32>}, {transform_indices = @transform_1, window_bounds = array<i64: 8, 8>}, {pipeline_mode = #tpu.pipeline_mode<synchronous>, transform_indices = @transform_2, window_bounds = array<i64: 32, 128>}, {pipeline_mode = #tpu.pipeline_mode<synchronous>, transform_indices = @transform_3, window_bounds = array<i64: 1, 128>}, {transform_indices = @transform_4, window_bounds = array<i64: 8, 1>}, {transform_indices = @transform_5, window_bounds = array<i64: 8, 128>}, {transform_indices = @transform_6, window_bounds = array<i64: 8, 128>}]} {
    %c0 = arith.constant 0 : index
    %c0_0 = arith.constant 0 : index
    %c0_1 = arith.constant 0 : index
    %0 = vector.load %arg1[%c0, %c0_0, %c0_1] : memref<8x8x32xbf16, #tpu.memory_space<vmem>>, vector<8x8x32xbf16>
    %1 = arith.extf %0 : vector<8x8x32xbf16> to vector<8x8x32xf32>
    %c0_2 = arith.constant 0 : index
    %c0_3 = arith.constant 0 : index
    %2 = vector.load %arg2[%c0_2, %c0_3] : memref<8x8xf32, #tpu.memory_space<vmem>>, vector<8x8xf32>
    %3 = vector.shape_cast %2 : vector<8x8xf32> to vector<8x8x1xf32>
    %4 = vector.broadcast %3 : vector<8x8x1xf32> to vector<8x8x32xf32>
    %5 = arith.mulf %1, %4 : vector<8x8x32xf32>
    %cst = arith.constant dense<0.000000e+00> : vector<8xf32>
    %6 = vector.multi_reduction <add>, %2, %cst [1] : vector<8x8xf32> to vector<8xf32>
    %7 = vector.shape_cast %6 : vector<8xf32> to vector<8x1xf32>
    %cst_4 = arith.constant 1.000000e+00 : f32
    %8 = vector.broadcast %cst_4 : f32 to vector<8x1xf32>
    %9 = arith.maximumf %7, %8 : vector<8x1xf32>
    %cst_5 = arith.constant dense<0.000000e+00> : vector<8x32xf32>
    %10 = vector.multi_reduction <add>, %5, %cst_5 [1] : vector<8x8x32xf32> to vector<8x32xf32>
    %11 = vector.broadcast %9 : vector<8x1xf32> to vector<8x32xf32>
    %12 = arith.divf %10, %11 : vector<8x32xf32>
    %c0_6 = arith.constant 0 : index
    %c0_7 = arith.constant 0 : index
    %13 = vector.load %arg3[%c0_6, %c0_7] : memref<32x128xf32, #tpu.memory_space<vmem>>, vector<32x128xf32>
    %cst_8 = arith.constant dense<0.000000e+00> : vector<8x128xf32>
    %14 = tpu.matmul %12, %13, %cst_8 {dimension_numbers = #tpu.dot_dimension_numbers<[1], [0], [0], [1], [0, 0, 1, 1], [], []>} : vector<8x32xf32>, vector<32x128xf32>, vector<8x128xf32> -> vector<8x128xf32>
    %c0_9 = arith.constant 0 : index
    %c0_10 = arith.constant 0 : index
    %15 = vector.load %arg4[%c0_9, %c0_10] : memref<1x128xf32, #tpu.memory_space<vmem>>, vector<1x128xf32>
    %16 = vector.broadcast %15 : vector<1x128xf32> to vector<8x128xf32>
    %17 = arith.addf %14, %16 : vector<8x128xf32>
    %c0_11 = arith.constant 0 : index
    %c0_12 = arith.constant 0 : index
    %18 = vector.load %arg6[%c0_11, %c0_12] : memref<8x128xf32, #tpu.memory_space<vmem>>, vector<8x128xf32>
    tpu.vector_store %arg6[%c0_11, %c0_12], %17 {strides = array<i32>} : memref<8x128xf32, #tpu.memory_space<vmem>>, vector<8x128xf32>,
    %19 = tpu.iota {dimensions = array<i32: 1>} : vector<8x128xi32>
    %c3_i32 = arith.constant 3 : i32
    %20 = vector.broadcast %c3_i32 : i32 to vector<8x128xi32>
    %21 = arith.cmpi slt, %19, %20 : vector<8x128xi32>
    %cst_13 = arith.constant 0xFF800000 : f32
    %22 = vector.broadcast %cst_13 : f32 to vector<8x128xf32>
    %23 = arith.select %21, %17, %22 : vector<8x128xi1>, vector<8x128xf32>
    %cst_14 = arith.constant dense<0xFF800000> : vector<8xf32>
    %24 = vector.multi_reduction <maximumf>, %23, %cst_14 [1] : vector<8x128xf32> to vector<8xf32>
    %25 = vector.shape_cast %24 : vector<8xf32> to vector<8x1xf32>
    %26 = vector.broadcast %25 : vector<8x1xf32> to vector<8x128xf32>
    %27 = arith.subf %23, %26 : vector<8x128xf32>
    %28 = math.exp %27 : vector<8x128xf32>
    %cst_15 = arith.constant dense<0.000000e+00> : vector<8xf32>
    %29 = vector.multi_reduction <add>, %28, %cst_15 [1] : vector<8x128xf32> to vector<8xf32>
    %30 = vector.shape_cast %29 : vector<8xf32> to vector<8x1xf32>
    %31 = math.log %30 : vector<8x1xf32>
    %32 = arith.addf %25, %31 : vector<8x1xf32>
    %33 = vector.broadcast %32 : vector<8x1xf32> to vector<8x128xf32>
    %34 = arith.subf %23, %33 : vector<8x128xf32>
    %c0_16 = arith.constant 0 : index
    %c0_17 = arith.constant 0 : index
    %35 = vector.load %arg5[%c0_16, %c0_17] : memref<8x1xi32, #tpu.memory_space<vmem>>, vector<8x1xi32>
    %36 = vector.broadcast %35 : vector<8x1xi32> to vector<8x128xi32>
    %37 = arith.cmpi eq, %19, %36 : vector<8x128xi32>
    %cst_18 = arith.constant 0.000000e+00 : f32
    %38 = vector.broadcast %cst_18 : f32 to vector<8x128xf32>
    %39 = arith.select %37, %34, %38 : vector<8x128xi1>, vector<8x128xf32>
    %cst_19 = arith.constant dense<0.000000e+00> : vector<8xf32>
    %40 = vector.multi_reduction <add>, %39, %cst_19 [1] : vector<8x128xf32> to vector<8xf32>
    %41 = vector.shape_cast %40 : vector<8xf32> to vector<8x1xf32>
    %cst_20 = arith.constant 0.000000e+00 : f32
    %42 = vector.broadcast %cst_20 : f32 to vector<8x1xf32>
    %43 = arith.subf %42, %41 : vector<8x1xf32>
    %44 = vector.shape_cast %43 : vector<8x1xf32> to vector<8x1xf32>
    %45 = vector.broadcast %44 : vector<8x1xf32> to vector<8x128xf32>
    %c0_21 = arith.constant 0 : index
    %c0_22 = arith.constant 0 : index
    %46 = vector.load %arg7[%c0_21, %c0_22] : memref<8x128xf32, #tpu.memory_space<vmem>>, vector<8x128xf32>
    tpu.vector_store %arg7[%c0_21, %c0_22], %45 {strides = array<i32>} : memref<8x128xf32, #tpu.memory_space<vmem>>, vector<8x128xf32>,
    return
  }
  func.func @transform_0(%arg0: i32) -> (i32, i32, i32) {
    %c0_i32 = arith.constant 0 : i32
    %c0_i32_0 = arith.constant 0 : i32
    %c0_i32_1 = arith.constant 0 : i32
    return %arg0, %c0_i32, %c0_i32_0 : i32, i32, i32
  }
  func.func @transform_1(%arg0: i32) -> (i32, i32) {
    %c0_i32 = arith.constant 0 : i32
    %c0_i32_0 = arith.constant 0 : i32
    return %arg0, %c0_i32 : i32, i32
  }
  func.func @transform_2(%arg0: i32) -> (i32, i32) {
    %c0_i32 = arith.constant 0 : i32
    %c0_i32_0 = arith.constant 0 : i32
    %c0_i32_1 = arith.constant 0 : i32
    return %c0_i32, %c0_i32_0 : i32, i32
  }
  func.func @transform_3(%arg0: i32) -> (i32, i32) {
    %c0_i32 = arith.constant 0 : i32
    %c0_i32_0 = arith.constant 0 : i32
    %c0_i32_1 = arith.constant 0 : i32
    return %c0_i32, %c0_i32_0 : i32, i32
  }
  func.func @transform_4(%arg0: i32) -> (i32, i32) {
    %c0_i32 = arith.constant 0 : i32
    %c0_i32_0 = arith.constant 0 : i32
    return %arg0, %c0_i32 : i32, i32
  }
  func.func @transform_5(%arg0: i32) -> (i32, i32) {
    %c0_i32 = arith.constant 0 : i32
    %c0_i32_0 = arith.constant 0 : i32
    return %arg0, %c0_i32 : i32, i32
  }
  func.func @transform_6(%arg0: i32) -> (i32, i32) {
    %c0_i32 = arith.constant 0 : i32
    %c0_i32_0 = arith.constant 0 : i32
    return %arg0, %c0_i32 : i32, i32
  }
}

</mosaic_0001>

<bundles_post_ra>
// kernel: tpu_custom_call.1
= control target key start
LH: loop header
LB: loop body
LE: loop exit
PB: predicated region body
PF: predicated region fallthrough
CT: control target
= control target key end

     0   :  { %12 = vsyncpa [#allocation3], 0  ;;  %s903_s0 = inlined_call_operand.hbm [shape: bf16[8,8,32], index: 0, kind: input, shape index: {}]   ;;  %s904_s1 = inlined_call_operand.vmem [shape: f32[8,8], index: 1, kind: input, shape index: {}]   ;;  %s905_s2 = inlined_call_operand.hbm [shape: f32[32,128], index: 2, kind: input, shape index: {}]   ;;  %s906_s3 = inlined_call_operand.vmem [shape: f32[1,128], index: 3, kind: input, shape index: {}]   ;;  %s907_s4 = inlined_call_operand.vmem [shape: s32[8,1], index: 4, kind: input, shape index: {}]   ;;  %s908_s5 = inlined_call_operand.hbm [shape: f32[8,128], index: 5, kind: output, shape index: {0}]   ;;  %s909_s6 = inlined_call_operand.hbm [shape: f32[8,128], index: 6, kind: output, shape index: {1}]  }
   0x1   :  { %13 = vsyncpa [#allocation6], 0 }
   0x2   :  { %14 = vsyncpa [#allocation4], 0 }
   0x3   :  { %15 = vsyncpa [#allocation9], 0  ;;  %s20_s23 = sshll.u32 %s903_s0, 4  ;;  %s612_s24 = smov [#allocation2]   ;;  %s21_s23 = int_to_ptr.hbm [resolvable:$true] %s20_s23 }
   0x4   :  { %s22_s25 = sshll.u32 %s612_s24, 4  ;;  %s35_s28 = sshll.u32 %s905_s2, 4  ;;  %s23_s25 = int_to_ptr.vmem [resolvable:$true] %s22_s25  ;;  %s36_s28 = int_to_ptr.hbm [resolvable:$true] %s35_s28 }
   0x5   :  { %s613_s29 = smov 64   ;;  %s614_s30 = smov 4  }
   0x6   :  { %28 = dma.hbm_to_vmem [thread:$0]  %s21_s23, 512, %s23_s25, [#allocation3], %s613_s29, %s613_s29, %s614_s30  }
   0x7   :  { %s615_s7 = smov [#allocation5]   ;;  %s616_s9 = smov 128  }
   0x8   :  { %s37_s8 = sshll.u32 %s615_s7, 4  ;;  %s617_s10 = smov 8   ;;  %s38_s8 = int_to_ptr.vmem [resolvable:$true] %s37_s8 }
   0x9   :  { %43 = dma.hbm_to_vmem [thread:$0]  %s36_s28, 512, %s38_s8, [#allocation6], %s616_s9, %s616_s9, %s617_s10  }
   0xa   :  { %604 = dma.done.wait [#allocation3], 512  }
   0xb   :  { %605 = vsyncadd [#allocation3], 4294966784 }
   0xc   :  { %606 = dma.done.wait [#allocation6], 512  }
   0xd   :  { %607 = vsyncadd [#allocation6], 4294966784  ;;  %v74_v0 = vlaneseq  ;;  %vm137_vm0 = vcmask 64512   ;;  %v72_v2 = vld [vmem:[%s904_s1] sm:$0xff]  ;;  %v471_v12 = vld [vmem:[#allocation2 + $0x8] sm:$0xff]   ;;  %vm142_vm1 = vcmask 261120  }
   0xe   :  { %v138_v3 = vsel %vm137_vm0, %v72_v2, 0.0  ;;  %v87_v4 = vperm.slane %v72_v2, 2  ;;  %v94_v5 = vperm.slane %v72_v2, 3  ;;  %v73_v6 = vperm.slane %v72_v2, 0  ;;  %v666_v15 = vld [vmem:[#allocation2 + $0x10] sm:$0xff]   ;;  %v670_v22 = vld [vmem:[#allocation2 + $0x18] sm:$0xff]  }
   0xf   :  { %v75_v1 = vshrl.u32 %v74_v0, 7  ;;  %139 = vadd.xlane.f32.xlu0 %v138_v3  ;;  %v101_v7 = vperm.slane %v72_v2, 4  ;;  %v108_v8 = vperm.slane %v72_v2, 5  ;;  %v115_v9 = vperm.slane %v72_v2, 6  ;;  %v681_v45 = vld [vmem:[#allocation2] sm:$0xff]   ;;  %v338_v54 = vld [vmem:[#allocation5 + $0x18] sm:$0xff] }
  0x10   :  { %v80_v10 = vperm.slane %v72_v2, 1  ;;  %v122_v11 = vperm.slane %v72_v2, 7  ;;  %v462_v13 = vunpack.c.h.bf16 %v471_v12  ;;  %v465_v17 = vunpack.c.l.bf16 %v666_v15  ;;  %v337_v55 = vld [vmem:[#allocation5 + $0x10] sm:$0xff]  ;;  %386 = vmatpush.msra.mxu0 %v338_v54  ;;  %v336_v3 = vld [vmem:[#allocation5 + $0x8] sm:$0xff]  ;;  %s427_s15 = sshll.u32 %s908_s5, 4  ;;  %s619_s16 = smov [#allocation7]   ;;  %s428_s15 = int_to_ptr.hbm [resolvable:$true] %s427_s15 }
  0x11   :  { %484 = vset.pattern.permute.xlu1 %v75_v1  ;;  %485 = vset.pattern.permute.xlu2 %v75_v1  ;;  %v469_v25 = vunpack.c.l.bf16 %v670_v22  ;;  %v461_v34 = vunpack.c.l.bf16 %v471_v12  ;;  %v457_v51 = vunpack.c.l.bf16 %v681_v45  ;;  %v466_v53 = vunpack.c.h.bf16 %v666_v15  ;;  %v335_v12 = vld [vmem:[#allocation5] sm:$0xff]  ;;  %s425_s17 = sshll.u32 %s619_s16, 4  ;;  %s438_s21 = sshll.u32 %s909_s6, 4  ;;  %s426_s17 = int_to_ptr.vmem [resolvable:$true] %s425_s17  ;;  %s439_s21 = int_to_ptr.hbm [resolvable:$true] %s438_s21 }
  0x12   :  { %483 = vset.pattern.permute.xlu0 %v75_v1  ;;  %v458_v60 = vunpack.c.h.bf16 %v681_v45  ;;  %v470_v2 = vunpack.c.h.bf16 %v670_v22  ;;  %387 = vmatpush.msra.mxu0 %v337_v55 }
  0x14   :  { %388 = vmatpush.msra.mxu0 %v336_v3 }
  0x16   :  { %389 = vmatpush.msra.mxu0 %v335_v12 }
  0x19   :  { %92 = vperm.xlu1 %484, %v87_v4   ;;  %99 = vperm.xlu2 %485, %v94_v5  }
  0x21   :  { %78 = vperm.xlu1 %484, %v73_v6   ;;  %106 = vperm.xlu2 %485, %v101_v7  }
  0x23   :  { %85 = vperm.xlu0 %483, %v80_v10  }
  0x29   :  { %113 = vperm.xlu1 %484, %v108_v8   ;;  %120 = vperm.xlu2 %485, %v115_v9  }
  0x31   :  { %127 = vperm.xlu1 %484, %v122_v11  }
  0x73   :  { %v100_v14 = vpop.permute.xlu2 %99 }
  0x74   :  { %v132_v16 = vmul.f32 %v462_v13, %v100_v14 }
  0x76   :  { %v164_v18 = vsel %vm142_vm1, %v132_v16, 0.0 }
  0x77   :  { %v165_v21 = vrot.slane %v164_v18, 4 }
  0x79   :  { %v166_v26 = vadd.f32 %v165_v21, %v164_v18 }
  0x7b   :  { %v107_v19 = vpop.permute.xlu2 %106  ;;  %v167_v30 = vrot.slane %v166_v26, 2 }
  0x7c   :  { %v133_v20 = vmul.f32 %v465_v17, %v107_v19 }
  0x7d   :  { %v168_v35 = vadd.f32 %v167_v30, %v166_v26 }
  0x7e   :  { %v171_v23 = vsel %vm142_vm1, %v133_v20, 0.0 }
  0x7f   :  { %v172_v24 = vrot.slane %v171_v23, 4  ;;  %v169_v44 = vrot.slane %v168_v35, 1 }
  0x81   :  { %v173_v27 = vadd.f32 %v172_v24, %v171_v23  ;;  %v690_v52 = vadd.f32 %v169_v44, %v168_v35 }
  0x82   :  { %v140_v36 = vpop.xlane.xlu0 %139 }
  0x83   :  { %v121_v28 = vpop.permute.xlu2 %120  ;;  %v174_v31 = vrot.slane %v173_v27, 2  ;;  %v675_v39 = vmax.f32 %v140_v36, 1.0 }
  0x84   :  { %v135_v29 = vmul.f32 %v469_v25, %v121_v28 }
  0x85   :  { %v175_v38 = vadd.f32 %v174_v31, %v173_v27  ;;  %v678_v41 = vrot.slane %v675_v39, 2  ;;  %488 = vrcp.f32 %v675_v39  ;;  %v684_v46 = vrot.slane %v675_v39, 5 }
  0x86   :  { %v185_v32 = vsel %vm142_vm1, %v135_v29, 0.0  ;;  %v698_v59 = vrot.slane %v675_v39, 1  ;;  %v226_v63 = vand.u32 2147483648, %v675_v39  ;;  %v224_v11 = vand.u32 2147483647, %v675_v39 }
  0x87   :  { %v186_v33 = vrot.slane %v185_v32, 4  ;;  %v176_v47 = vrot.slane %v175_v38, 1  ;;  %490 = vrcp.f32 %v678_v41  ;;  %v256_v61 = vand.u32 2147483648, %v678_v41 }
  0x88   :  { %492 = vrcp.f32 %v684_v46  ;;  %v254_v9 = vand.u32 2147483647, %v678_v41  ;;  %vm250_vm2 = vweird.f32 %v678_v41  ;;  %vm220_vm3 = vweird.f32 %v675_v39 }
  0x89   :  { %v187_v37 = vadd.f32 %v186_v33, %v185_v32  ;;  %v695_v57 = vadd.f32 %v176_v47, %v175_v38  ;;  %494 = vrcp.f32 %v698_v59  ;;  %v719_v15 = vrot.slane %v675_v39, 3 }
  0x8a   :  { %v257_v20 = vor.u32 1.1754944e-38, %v256_v61  ;;  %v227_v24 = vor.u32 1.1754944e-38, %v226_v63  ;;  %vm727_vm4 = vcmp.eq.f32.partialorder %v254_v9, 8.507059e+37  ;;  %vm731_vm5 = vcmp.eq.f32.partialorder %v224_v11, 8.507059e+37 }
  0x8b   :  { %v93_v40 = vpop.permute.xlu1 %92  ;;  %v188_v43 = vrot.slane %v187_v37, 2  ;;  %v693_v56 = vpop.eup %488  ;;  %v301_v30 = vand.u32 2147483648, %v684_v46  ;;  %vm295_vm7 = vweird.f32 %v684_v46  ;;  %v299_v32 = vand.u32 2147483647, %v684_v46 }
  0x8c   :  { %v131_v42 = vmul.f32 %v461_v34, %v93_v40  ;;  %v216_v62 = vmul.f32 %v693_v56, %v675_v39  ;;  %vm221_vm6 = vweird.f32 %v693_v56  ;;  %v241_v33 = vand.u32 2147483648, %v698_v59 }
  0x8d   :  { %v189_v50 = vadd.f32 %v188_v43, %v187_v37  ;;  %v706_v4 = vpop.eup %490  ;;  %496 = vrcp.f32 %v719_v15  ;;  %vm753_vm9 = vmor %vm220_vm3, %vm221_vm6  ;;  %v302_v47 = vor.u32 1.1754944e-38, %v301_v30  ;;  %vm768_vm12 = vcmp.eq.f32.partialorder %v299_v32, 8.507059e+37 }
  0x8e   :  { %v157_v48 = vsel %vm142_vm1, %v131_v42, 0.0  ;;  %v246_v8 = vmul.f32 %v706_v4, %v678_v41  ;;  %v217_v10 = vsub.f32 1.0, %v216_v62  ;;  %v713_v13 = vpop.eup %492  ;;  %vm251_vm8 = vweird.f32 %v706_v4 }
  0x8f   :  { %v158_v49 = vrot.slane %v157_v48, 4  ;;  %v190_v6 = vrot.slane %v189_v50, 1  ;;  %v291_v19 = vmul.f32 %v713_v13, %v684_v46  ;;  %v736_v31 = vpop.eup %494  ;;  %vm763_vm10 = vmor %vm250_vm2, %vm251_vm8  ;;  %vm296_vm11 = vweird.f32 %v713_v13 }
  0x90   :  { %v247_v16 = vsub.f32 1.0, %v246_v8  ;;  %v218_v17 = vmul.f32 %v693_v56, %v217_v10  ;;  %v231_v43 = vmul.f32 %v736_v31, %v698_v59  ;;  %vm235_vm13 = vweird.f32 %v698_v59  ;;  %vm804_vm15 = vmor %vm295_vm7, %vm296_vm11 }
  0x91   :  { %v159_v58 = vadd.f32 %v158_v49, %v157_v48  ;;  %v724_v23 = vadd.f32 %v190_v6, %v189_v50  ;;  %v292_v29 = vsub.f32 1.0, %v291_v19  ;;  %v239_v48 = vand.u32 2147483647, %v698_v59 }
  0x92   :  { %v248_v25 = vmul.f32 %v706_v4, %v247_v16  ;;  %v219_v35 = vadd.f32 %v693_v56, %v218_v17  ;;  %v759_v50 = vrot.slane %v675_v39, 4  ;;  %v232_v55 = vsub.f32 1.0, %v231_v43 }
  0x93   :  { %v79_v1 = vpop.permute.xlu1 %78  ;;  %v160_v5 = vrot.slane %v159_v58, 2  ;;  %v293_v40 = vmul.f32 %v713_v13, %v292_v29  ;;  %v782_v63 = vpop.eup %496  ;;  %v787_v6 = vrot.slane %v675_v39, 6  ;;  %vm236_vm14 = vweird.f32 %v736_v31 }
  0x94   :  { %v129_v7 = vmul.f32 %v457_v51, %v79_v1  ;;  %v249_v34 = vadd.f32 %v706_v4, %v248_v25  ;;  %v223_v41 = vsel %vm753_vm9, %v693_v56, %v219_v35  ;;  %v791_v56 = vrot.slane %v675_v39, 7 }
  0x95   :  { %v161_v21 = vadd.f32 %v160_v5, %v159_v58  ;;  %v86_v44 = vpop.permute.xlu0 %85  ;;  %v773_v58 = vor.u32 1.1754944e-38, %v241_v33  ;;  %v294_v3 = vadd.f32 %v713_v13, %v293_v40  ;;  %v228_v10 = vsel %vm731_vm5, %v227_v24, %v223_v41  ;;  %vm833_vm5 = vmor %vm235_vm13, %vm236_vm14 }
  0x96   :  { %v143_v14 = vsel %vm142_vm1, %v129_v7, 0.0  ;;  %v130_v49 = vmul.f32 %v458_v60, %v86_v44  ;;  %v253_v60 = vsel %vm763_vm10, %v706_v4, %v249_v34  ;;  %v233_v4 = vmul.f32 %v736_v31, %v232_v55 }
  0x97   :  { %v144_v18 = vrot.slane %v143_v14, 4  ;;  %v162_v38 = vrot.slane %v161_v21, 1  ;;  %v258_v9 = vsel %vm727_vm4, %v257_v20, %v253_v60  ;;  %v261_v11 = vmul.f32 %v782_v63, %v719_v15 }
  0x98   :  { %v150_v5 = vsel %vm142_vm1, %v130_v49, 0.0  ;;  %vm808_vm0 = vcmp.eq.f32.partialorder %v239_v48, 8.507059e+37  ;;  %vm265_vm2 = vweird.f32 %v719_v15  ;;  %v298_v19 = vsel %vm804_vm15, %v713_v13, %v294_v3 }
  0x99   :  { %v145_v28 = vadd.f32 %v144_v18, %v143_v14  ;;  %v163_v1 = vadd.f32 %v162_v38, %v161_v21  ;;  %v151_v8 = vrot.slane %v150_v5, 4  ;;  %v262_v20 = vsub.f32 1.0, %v261_v11 }
  0x9a   :  { %498 = vrcp.f32 %v759_v50  ;;  %v234_v25 = vadd.f32 %v736_v31, %v233_v4  ;;  %vm352_vm3 = vcmask 1041409   ;;  %vm266_vm4 = vweird.f32 %v782_v63 }
  0x9b   :  { %v146_v36 = vrot.slane %v145_v28, 2  ;;  %v114_v37 = vpop.permute.xlu1 %113  ;;  %v152_v17 = vadd.f32 %v151_v8, %v150_v5  ;;  %v819_v21 = vmul.f32 %v258_v9, %v163_v1  ;;  %v269_v13 = vand.u32 2147483647, %v719_v15  ;;  %vm844_vm6 = vmor %vm265_vm2, %vm266_vm4 }
  0x9c   :  { %v134_v42 = vmul.f32 %v466_v53, %v114_v37  ;;  %v303_v22 = vsel %vm768_vm12, %v302_v47, %v298_v19  ;;  %v271_v30 = vand.u32 2147483648, %v719_v15  ;;  %500 = vrcp.f32 %v787_v6 }
  0x9d   :  { %v147_v61 = vadd.f32 %v146_v36, %v145_v28  ;;  %v153_v26 = vrot.slane %v152_v17, 2  ;;  %v263_v28 = vmul.f32 %v782_v63, %v262_v20  ;;  %v238_v36 = vsel %vm833_vm5, %v736_v31, %v234_v25 }
  0x9e   :  { %v178_v54 = vsel %vm142_vm1, %v134_v42, 0.0  ;;  %v284_v59 = vand.u32 2147483647, %v759_v50  ;;  %v354_v43 = vrot.slane %v819_v21, 6  ;;  %vm270_vm7 = vcmp.eq.f32.partialorder %v269_v13, 8.507059e+37 }
  0x9f   :  { %v179_v62 = vrot.slane %v178_v54, 4  ;;  %v148_v12 = vrot.slane %v147_v61, 1  ;;  %v264_v35 = vadd.f32 %v782_v63, %v263_v28  ;;  %502 = vrcp.f32 %v791_v56 }
  0xa0   :  { %v499_v42 = vpop.eup %498  ;;  %v272_v47 = vor.u32 1.1754944e-38, %v271_v30  ;;  %v286_v15 = vand.u32 2147483648, %v759_v50  ;;  %v243_v51 = vsel %vm808_vm0, %v773_v58, %v238_v36  ;;  %vm280_vm8 = vweird.f32 %v759_v50 }
  0xa1   :  { %v180_v7 = vadd.f32 %v179_v62, %v178_v54  ;;  %v149_v32 = vadd.f32 %v148_v12, %v147_v61  ;;  %v268_v44 = vsel %vm844_vm6, %v782_v63, %v264_v35  ;;  %v276_v53 = vmul.f32 %v499_v42, %v759_v50 }
  0xa2   :  { %v273_v55 = vsel %vm270_vm7, %v272_v47, %v268_v44  ;;  %vm860_vm9 = vcmp.eq.f32.partialorder %v284_v59, 8.507059e+37  ;;  %v501_v41 = vpop.eup %500  ;;  %vm310_vm10 = vweird.f32 %v787_v6  ;;  %v314_v63 = vand.u32 2147483647, %v787_v6 }
  0xa3   :  { %v181_v39 = vrot.slane %v180_v7, 2  ;;  %v128_v18 = vpop.permute.xlu1 %127  ;;  %v229_v48 = vmul.f32 %v228_v10, %v149_v32  ;;  %v277_v62 = vsub.f32 1.0, %v276_v53  ;;  %v287_v3 = vor.u32 1.1754944e-38, %v286_v15 }
  0xa4   :  { %v136_v46 = vmul.f32 %v470_v2, %v128_v18  ;;  %v154_v2 = vadd.f32 %v153_v26, %v152_v17  ;;  %v306_v58 = vmul.f32 %v501_v41, %v787_v6  ;;  %v316_v5 = vand.u32 2147483648, %v787_v6 }
  0xa5   :  { %v182_v24 = vadd.f32 %v181_v39, %v180_v7  ;;  %v503_v7 = vpop.eup %502  ;;  %v274_v8 = vmul.f32 %v273_v55, %v690_v52  ;;  %v278_v9 = vmul.f32 %v499_v42, %v277_v62  ;;  %vm281_vm11 = vweird.f32 %v499_v42 }
  0xa6   :  { %v192_v27 = vsel %vm142_vm1, %v136_v46, 0.0  ;;  %v155_v37 = vrot.slane %v154_v2, 1  ;;  %v307_v11 = vsub.f32 1.0, %v306_v58  ;;  %v321_v12 = vmul.f32 %v503_v7, %v791_v56  ;;  %vm282_vm14 = vmor %vm280_vm8, %vm281_vm11 }
  0xa7   :  { %v193_v29 = vrot.slane %v192_v27, 4  ;;  %v183_v33 = vrot.slane %v182_v24, 1  ;;  %vm355_vm12 = vcmask 1042434   ;;  %v279_v39 = vadd.f32 %v499_v42, %v278_v9 }
  0xa8   :  { %v156_v31 = vadd.f32 %v155_v37, %v154_v2  ;;  %vm871_vm13 = vcmp.eq.f32.partialorder %v314_v63, 8.507059e+37  ;;  %v329_v17 = vand.u32 2147483647, %v791_v56  ;;  %v308_v52 = vmul.f32 %v501_v41, %v307_v11 }
  0xa9   :  { %v194_v38 = vadd.f32 %v193_v29, %v192_v27  ;;  %v184_v49 = vadd.f32 %v183_v33, %v182_v24  ;;  %vm311_vm15 = vweird.f32 %v501_v41  ;;  %v322_v18 = vsub.f32 1.0, %v321_v12 }
  0xaa   :  { %v244_v54 = vmul.f32 %v243_v51, %v156_v31  ;;  %v331_v19 = vand.u32 2147483648, %v791_v56  ;;  %v283_v46 = vsel %vm282_vm14, %v499_v42, %v279_v39  ;;  %vm326_vm0 = vweird.f32 %v503_v7 }
  0xab   :  { %v195_v45 = vrot.slane %v194_v38, 2  ;;  %v304_v4 = vmul.f32 %v303_v22, %v184_v49  ;;  %vm358_vm2 = vcmask 1043459   ;;  %v288_v21 = vsel %vm860_vm9, %v287_v3, %v283_v46 }
  0xac   :  { %v351_v1 = vrot.slane %v244_v54, 7  ;;  %v309_v24 = vadd.f32 %v501_v41, %v308_v52  ;;  %v323_v25 = vmul.f32 %v503_v7, %v322_v18  ;;  %v357_v26 = vrot.slane %v274_v8, 5 }
  0xad   :  { %v196_v61 = vadd.f32 %v195_v45, %v194_v38  ;;  %v289_v28 = vmul.f32 %v288_v21, %v695_v57  ;;  %v317_v50 = vor.u32 1.1754944e-38, %v316_v5  ;;  %vm325_vm4 = vweird.f32 %v791_v56  ;;  %v410_v45 = vld [vmem:[%s907_s4] sm:$0xff]  ;;  %s620_s4 = smov [#allocation8]  }
  0xae   :  { %v353_v10 = vsel %vm352_vm3, %v351_v1, %v229_v48  ;;  %vm312_vm3 = vmor %vm310_vm10, %vm311_vm15  ;;  %v324_v22 = vadd.f32 %v503_v7, %v323_v25  ;;  %vm361_vm5 = vcmask 1044484   ;;  %v332_v30 = vor.u32 1.1754944e-38, %v331_v19  ;;  %s436_s18 = sshll.u32 %s620_s4, 4  ;;  %s437_s18 = int_to_ptr.vmem [resolvable:$true] %s436_s18 }
  0xaf   :  { %v197_v14 = vrot.slane %v196_v61, 1  ;;  %v356_v20 = vsel %vm355_vm12, %v354_v43, %v353_v10  ;;  %v313_v13 = vsel %vm312_vm3, %v501_v41, %v309_v24  ;;  %vm327_vm6 = vmor %vm325_vm4, %vm326_vm0  ;;  %v360_v32 = vrot.slane %v289_v28, 4 }
  0xb0   :  { %v359_v2 = vsel %vm358_vm2, %v357_v26, %v356_v20  ;;  %v318_v29 = vsel %vm871_vm13, %v317_v50, %v313_v13  ;;  %vm364_vm7 = vcmask 1045509   ;;  %v363_v33 = vrot.slane %v304_v4, 3 }
  0xb1   :  { %v198_v27 = vadd.f32 %v197_v14, %v196_v61  ;;  %v319_v57 = vmul.f32 %v318_v29, %v724_v23  ;;  %v328_v6 = vsel %vm327_vm6, %v503_v7, %v324_v22  ;;  %vm330_vm8 = vcmp.eq.f32.partialorder %v329_v17, 8.507059e+37  ;;  %v487_v23 = vld [vmem:[%s906_s3] ss:$0 sm:$0xff] }
  0xb2   :  { %v333_v34 = vsel %vm330_vm8, %v332_v30, %v328_v6  ;;  %v362_v35 = vsel %vm361_vm5, %v360_v32, %v359_v2  ;;  %vm367_vm9 = vcmask 1046534   ;;  %vm370_vm10 = vcmask 1047559  }
  0xb3   :  { %v334_v56 = vmul.f32 %v333_v34, %v198_v27  ;;  %v365_v36 = vsel %vm364_vm7, %v363_v33, %v362_v35  ;;  %v366_v37 = vrot.slane %v319_v57, 2  ;;  %v396_v42 = vand.u32 127, %v74_v0 }
  0xb4   :  { %v618_v47 = vmov 0  }
  0xb5   :  { %v368_v38 = vsel %vm367_vm9, %v366_v37, %v365_v36  ;;  %v369_v40 = vrot.slane %v334_v56, 1  ;;  %vm397_vm11 = vcmp.lt.s32.totalorder %v396_v42, 3  ;;  %486 = vset.pattern.permute.xlu0 %v618_v47 }
  0xb6   :  { %412 = vperm.xlu0 %486, %v410_v45  }
  0xb7   :  { %v371_v59 = vsel %vm370_vm10, %v369_v40, %v368_v38 }
  0xb8   :  { %454 = vmatmul.msk.f32.vlgmr.msra.gmra.mxu0 %vm142_vm1, %v371_v59 }
 0x128   :  { %v413_v55 = vpop.permute.xlu0 %412 }
 0x129   :  { %vm414_vm1 = vcmp.eq.s32.totalorder %v396_v42, %v413_v55 }
 0x135   :  { %v391_v43 = vpop.f32.mrf.mxu0 }
 0x136   :  { %v392_v44 = vadd.f32 %v487_v23, %v391_v43 }
 0x138   :  { %394 = vst [vmem:[#allocation7] sm:$0xff] %v392_v44  ;;  %v398_v31 = vsel %vm397_vm11, %v392_v44, -inf }
 0x139   :  { %399 = vmax.xlane.f32.xlu2 %v398_v31  ;;  %430 = dma.vmem_to_hbm [thread:$0]  %s426_s17, 128, %s428_s15, [#allocation4]  }
 0x1ac   :  { %v400_v15 = vpop.xlane.xlu2 %399 }
 0x1ad   :  { %v401_v48 = vsub.f32 %v398_v31, %v400_v15 }
 0x1af   :  { %v402_v0 = vmul.f32 1.442695, %v401_v48 }
 0x1b1   :  { %504 = vpow2.f32 %v402_v0 }
 0x1b7   :  { %v505_v49 = vpop.eup %504 }
 0x1b8   :  { %404 = vadd.xlane.f32.xlu1 %v505_v49 }
 0x22b   :  { %v405_v51 = vpop.xlane.xlu1 %404 }
 0x22c   :  { %506 = vlog2.f32 %v405_v51 }
 0x232   :  { %v507_v53 = vpop.eup %506 }
 0x233   :  { %v407_v54 = vmul.f32 0.6931472, %v507_v53 }
 0x235   :  { %v408_v60 = vadd.f32 %v407_v54, %v400_v15 }
 0x237   :  { %v409_v41 = vsub.f32 %v398_v31, %v408_v60 }
 0x239   :  { %v415_v61 = vsel %vm414_vm1, %v409_v41, 0.0 }
 0x23a   :  { %416 = vadd.xlane.f32.xlu0 %v415_v61 }
 0x2ad   :  { %v417_v62 = vpop.xlane.xlu0 %416 }
 0x2ae   :  { %v418_v63 = vsub.f32 0.0, %v417_v62 }
 0x2b0   :  { %419 = vst [vmem:[#allocation8] sm:$0xff] %v418_v63 }
 0x2b1   :  { %441 = dma.vmem_to_hbm [thread:$0]  %s437_s18, 128, %s439_s21, [#allocation9]  }
 0x2b2   :  { %608 = dma.done.wait [#allocation4], 128  }
 0x2b3   :  { %609 = vsyncadd [#allocation4], 4294967168 }
 0x2b4   :  { %610 = dma.done.wait [#allocation9], 128  }
 0x2b5   :  { %611 = vsyncadd [#allocation9], 4294967168 }
 0x2b6   :  { %450 = vsyncpa [#allocation3], 1 }
 0x2b7   :  { %451 = vsyncpa [#allocation6], 1 }
 0x2b8   :  { %452 = vsyncpa [#allocation4], 1 }
 0x2b9   :  { %453 = vsyncpa [#allocation9], 1 }

</bundles_post_ra>
